<compile_context>
chip_gen: v7x
topology: tpu7x:2x2x1
jax: 0.10.0
libtpu: 0.0.40
codegen_flags: <defaults>
</compile_context>

<pallas_src>
import functools

import jax
import jax.numpy as jnp
from jax.experimental import pallas as pl
from jax.experimental.pallas import tpu as pltpu


def hierec_kernel(sub_idx_ref, cat_idx_ref, vec_ref,
                  sub_repr_ref, sub_w_ref, cat_repr_ref, cat_w_ref,
                  user_repr_ref, out_ref, *, lambda_t, lambda_s):
    f32 = jnp.float32
    vec = vec_ref[...]                       # (TB, N, D), native dtype
    sub_idx = sub_idx_ref[...]               # (TB, N) int32
    cat_idx = cat_idx_ref[...]               # (TB, N) int32

    TB, N, _D = vec.shape
    S = sub_repr_ref.shape[1]
    C = cat_repr_ref.shape[1]
    K = S + C
    lambda_u = 1.0 - lambda_s - lambda_t

    # Fused key matrix of both taxonomy levels: (TB, S+C, D).  One MXU
    # contraction over D replaces the one-hot bmm gathers plus the per-branch
    # elementwise-mul + D-axis reductions of the reference implementation.
    key = jnp.concatenate([sub_repr_ref[...], cat_repr_ref[...]], axis=1)
    scores = jnp.einsum('bnd,bkd->bnk', vec, key,
                        preferred_element_type=f32)              # (TB, N, K)

    # Per-(batch, k) coefficient: lambda_s * sub_w for k < S, lambda_t * cat_w
    # for k >= S.  (lambdas folded in so the final sum needs no extra scaling.)
    coef = jnp.concatenate(
        [lambda_s * sub_w_ref[...].astype(f32),
         lambda_t * cat_w_ref[...].astype(f32)], axis=-1)        # (TB, K)

    # Integer-compare column selection — no float one-hot is materialized.
    # (Out-of-range indices select nothing, i.e. contribute 0, same as before.)
    k_iota = jax.lax.broadcasted_iota(jnp.int32, (TB, N, K), 2)
    sel = ((k_iota == sub_idx[:, :, None])
           | (k_iota == (cat_idx + S)[:, :, None]))              # (TB, N, K)

    tax_score = jnp.sum(jnp.where(sel, scores * coef[:, None, :], 0.0),
                        axis=-1)                                 # (TB, N)

    # User branch: small per-row dot product on the VPU (cast to f32 so the
    # VALU path stays f32 even for bf16 inputs, required on v5e).
    user_score = jnp.sum(
        vec.astype(f32) * user_repr_ref[...].astype(f32)[:, None, :], axis=-1)

    out_ref[...] = (tax_score + lambda_u * user_score).astype(out_ref.dtype)


def _pick_batch_tile(B, N, D, S, C, budget_bytes=8 * 1024 * 1024):
    """Largest multiple-of-8 divisor of B whose working set fits the budget.

    Conservative f32-equivalent estimate: double-buffered DMA blocks (x2) plus
    the main in-kernel intermediates (key, scores, mask/select temporaries).
    Falls back to whole-batch residency if no aligned divisor exists.
    """
    K = S + C
    per_row = 4 * (2 * (N * D + K * D + D + 3 * N + K)   # pipelined blocks x2
                   + K * D + 3 * N * K)                  # key, scores, temps
    cap = max(1, budget_bytes // per_row)
    best = None
    t = 8
    while t <= min(B, cap):
        if B % t == 0:
            best = t
        t += 8
    return best if best is not None else B


def hierec_click_predictor(candidate_news, user, *, lambda_t=0.15, lambda_s=0.7,
                           batch_tile=None):
    assert lambda_t + lambda_s < 1
    sub_repr, sub_w, cat_repr, cat_w, user_repr = user
    vec = candidate_news['vectors']
    sub_idx = candidate_news['subcategory'].astype(jnp.int32)
    cat_idx = candidate_news['category'].astype(jnp.int32)

    B, N, D = vec.shape
    S = sub_repr.shape[1]
    C = cat_repr.shape[1]

    tb = int(batch_tile) if batch_tile is not None else _pick_batch_tile(B, N, D, S, C)
    assert B % tb == 0, "batch tile must divide the batch size"
    assert tb == B or tb % 8 == 0, \
        "batch tile must be a multiple of 8 (sublane alignment) or the full batch"

    grid = (B // tb,)
    b3 = lambda b: (b, 0, 0)
    b2 = lambda b: (b, 0)

    kernel = functools.partial(hierec_kernel,
                               lambda_t=float(lambda_t), lambda_s=float(lambda_s))

    return pl.pallas_call(
        kernel,
        out_shape=jax.ShapeDtypeStruct((B, N), jnp.float32),
        grid=grid,
        in_specs=[
            pl.BlockSpec((tb, N), b2),       # subcategory indices
            pl.BlockSpec((tb, N), b2),       # category indices
            pl.BlockSpec((tb, N, D), b3),    # candidate vectors
            pl.BlockSpec((tb, S, D), b3),    # subcategory_repr
            pl.BlockSpec((tb, S), b2),       # subcategory_weights
            pl.BlockSpec((tb, C, D), b3),    # category_repr
            pl.BlockSpec((tb, C), b2),       # category_weights
            pl.BlockSpec((tb, D), b2),       # user_repr
        ],
        out_specs=pl.BlockSpec((tb, N), b2),
        compiler_params=pltpu.CompilerParams(
            dimension_semantics=("parallel",),     # shard batch tiles across TCs
            vmem_limit_bytes=32 * 1024 * 1024,
        ),
    )(sub_idx, cat_idx, vec, sub_repr, sub_w, cat_repr, cat_w, user_repr)


def _reference(candidate_news, user, lambda_t=0.15, lambda_s=0.7):
    """Plain-JAX reference mirroring the PyTorch forward (for sanity check)."""
    sub_repr, sub_w, cat_repr, cat_w, user_repr = user
    S, C = sub_repr.shape[1], cat_repr.shape[1]
    vec = candidate_news['vectors']
    sub_oh = jax.nn.one_hot(candidate_news['subcategory'], S, dtype=jnp.float32)
    cat_oh = jax.nn.one_hot(candidate_news['category'], C, dtype=jnp.float32)
    sub_emb = jnp.einsum('bns,bsd->bnd', sub_oh, sub_repr)
    cat_emb = jnp.einsum('bnc,bcd->bnd', cat_oh, cat_repr)
    sub_score = jnp.sum(vec * sub_emb, -1) * jnp.einsum('bns,bs->bn', sub_oh, sub_w)
    cat_score = jnp.sum(vec * cat_emb, -1) * jnp.einsum('bnc,bc->bn', cat_oh, cat_w)
    user_score = jnp.einsum('bnd,bd->bn', vec, user_repr)
    return (lambda_s * sub_score + lambda_t * cat_score
            + (1 - lambda_s - lambda_t) * user_score)


if __name__ == "__main__":
    key = jax.random.PRNGKey(0)
    B, N, D, S, C = 32, 8, 32, 16, 8   # batch, candidates, hidden, #subcats, #cats

    k = jax.random.split(key, 8)
    candidate_news = {
        'vectors': jax.random.normal(k[0], (B, N, D), dtype=jnp.float32),
        'subcategory': jax.random.randint(k[1], (B, N), 0, S, dtype=jnp.int32),
        'category': jax.random.randint(k[2], (B, N), 0, C, dtype=jnp.int32),
    }
    user = (
        jax.random.normal(k[3], (B, S, D), dtype=jnp.float32),   # subcategory_repr
        jax.random.uniform(k[4], (B, S), dtype=jnp.float32),     # subcategory_weights
        jax.random.normal(k[5], (B, C, D), dtype=jnp.float32),   # category_repr
        jax.random.uniform(k[6], (B, C), dtype=jnp.float32),     # category_weights
        jax.random.normal(k[7], (B, D), dtype=jnp.float32),      # user_repr
    )

    ref = _reference(candidate_news, user)

    # Multi-step pipelined grid: 4 batch tiles of 8 on a 'parallel' axis.
    out = jax.block_until_ready(
        hierec_click_predictor(candidate_news, user, batch_tile=8))
    assert out.shape == (B, N)
    assert jnp.allclose(out, ref, atol=1e-4, rtol=1e-4), "mismatch vs reference (tiled)"

    # Auto tile picker path (largest aligned tile that fits the VMEM budget).
    out2 = jax.block_until_ready(hierec_click_predictor(candidate_news, user))
    assert jnp.allclose(out2, ref, atol=1e-4, rtol=1e-4), "mismatch vs reference (auto)"

    print("KERNEL_OK")
</pallas_src>

<mosaic_0001>
module attributes {stable_mosaic.version = 11 : i64} {
  func.func @hierec_kernel(%arg0: i32, %arg1: memref<8x8xi32, #tpu.memory_space<vmem>>, %arg2: memref<8x8xi32, #tpu.memory_space<vmem>>, %arg3: memref<8x8x32xf32, #tpu.memory_space<vmem>>, %arg4: memref<8x16x32xf32, #tpu.memory_space<vmem>>, %arg5: memref<8x16xf32, #tpu.memory_space<vmem>>, %arg6: memref<8x8x32xf32, #tpu.memory_space<vmem>>, %arg7: memref<8x8xf32, #tpu.memory_space<vmem>>, %arg8: memref<8x32xf32, #tpu.memory_space<vmem>>, %arg9: memref<8x8xf32, #tpu.memory_space<vmem>>) attributes {dimension_semantics = [#tpu.dimension_semantics<parallel>], iteration_bounds = array<i64: 4>, scalar_prefetch = 0 : i64, scratch_operands = 0 : i64, tpu.core_type = #tpu.core_type<tc>, window_params = [{transform_indices = @transform_0, window_bounds = array<i64: 8, 8>}, {transform_indices = @transform_1, window_bounds = array<i64: 8, 8>}, {transform_indices = @transform_2, window_bounds = array<i64: 8, 8, 32>}, {transform_indices = @transform_3, window_bounds = array<i64: 8, 16, 32>}, {transform_indices = @transform_4, window_bounds = array<i64: 8, 16>}, {transform_indices = @transform_5, window_bounds = array<i64: 8, 8, 32>}, {transform_indices = @transform_6, window_bounds = array<i64: 8, 8>}, {transform_indices = @transform_7, window_bounds = array<i64: 8, 32>}, {transform_indices = @transform_8, window_bounds = array<i64: 8, 8>}]} {
    %c0 = arith.constant 0 : index
    %c0_0 = arith.constant 0 : index
    %c0_1 = arith.constant 0 : index
    %0 = vector.load %arg3[%c0, %c0_0, %c0_1] : memref<8x8x32xf32, #tpu.memory_space<vmem>>, vector<8x8x32xf32>
    %c0_2 = arith.constant 0 : index
    %c0_3 = arith.constant 0 : index
    %1 = vector.load %arg1[%c0_2, %c0_3] : memref<8x8xi32, #tpu.memory_space<vmem>>, vector<8x8xi32>
    %c0_4 = arith.constant 0 : index
    %c0_5 = arith.constant 0 : index
    %2 = vector.load %arg2[%c0_4, %c0_5] : memref<8x8xi32, #tpu.memory_space<vmem>>, vector<8x8xi32>
    %c0_6 = arith.constant 0 : index
    %c0_7 = arith.constant 0 : index
    %c0_8 = arith.constant 0 : index
    %3 = vector.load %arg4[%c0_6, %c0_7, %c0_8] : memref<8x16x32xf32, #tpu.memory_space<vmem>>, vector<8x16x32xf32>
    %c0_9 = arith.constant 0 : index
    %c0_10 = arith.constant 0 : index
    %c0_11 = arith.constant 0 : index
    %4 = vector.load %arg6[%c0_9, %c0_10, %c0_11] : memref<8x8x32xf32, #tpu.memory_space<vmem>>, vector<8x8x32xf32>
    %5 = tpu.concatenate %3, %4 in 1 : vector<8x16x32xf32>, vector<8x8x32xf32> -> vector<8x24x32xf32>
    "tpu.trace_start"() <{level = 10 : i32, message = "bnd,bkd->bnk"}> : () -> ()
    %cst = arith.constant dense<0.000000e+00> : vector<8x8x24xf32>
    %6 = tpu.matmul %0, %5, %cst {dimension_numbers = #tpu.dot_dimension_numbers<[2], [2], [1], [1], [0, 0, 0, 1, 1, 1], [0], [0]>} : vector<8x8x32xf32>, vector<8x24x32xf32>, vector<8x8x24xf32> -> vector<8x8x24xf32>
    "tpu.trace_stop"() : () -> ()
    %c0_12 = arith.constant 0 : index
    %c0_13 = arith.constant 0 : index
    %7 = vector.load %arg5[%c0_12, %c0_13] : memref<8x16xf32, #tpu.memory_space<vmem>>, vector<8x16xf32>
    %cst_14 = arith.constant 0.699999988 : f32
    %8 = vector.broadcast %cst_14 : f32 to vector<8x16xf32>
    %9 = arith.mulf %8, %7 : vector<8x16xf32>
    %c0_15 = arith.constant 0 : index
    %c0_16 = arith.constant 0 : index
    %10 = vector.load %arg7[%c0_15, %c0_16] : memref<8x8xf32, #tpu.memory_space<vmem>>, vector<8x8xf32>
    %cst_17 = arith.constant 1.500000e-01 : f32
    %11 = vector.broadcast %cst_17 : f32 to vector<8x8xf32>
    %12 = arith.mulf %11, %10 : vector<8x8xf32>
    %13 = tpu.concatenate %9, %12 in 1 : vector<8x16xf32>, vector<8x8xf32> -> vector<8x24xf32>
    %14 = tpu.iota {dimensions = array<i32: 2>} : vector<8x8x24xi32>
    %15 = vector.shape_cast %1 : vector<8x8xi32> to vector<8x8x1xi32>
    %16 = vector.broadcast %15 : vector<8x8x1xi32> to vector<8x8x24xi32>
    %17 = arith.cmpi eq, %14, %16 : vector<8x8x24xi32>
    %c16_i32 = arith.constant 16 : i32
    %18 = vector.broadcast %c16_i32 : i32 to vector<8x8xi32>
    %19 = arith.addi %2, %18 : vector<8x8xi32>
    %20 = vector.shape_cast %19 : vector<8x8xi32> to vector<8x8x1xi32>
    %21 = vector.broadcast %20 : vector<8x8x1xi32> to vector<8x8x24xi32>
    %22 = arith.cmpi eq, %14, %21 : vector<8x8x24xi32>
    %23 = arith.ori %17, %22 : vector<8x8x24xi1>
    %24 = vector.shape_cast %13 : vector<8x24xf32> to vector<8x1x24xf32>
    %25 = vector.broadcast %24 : vector<8x1x24xf32> to vector<8x8x24xf32>
    %26 = arith.mulf %6, %25 : vector<8x8x24xf32>
    %cst_18 = arith.constant 0.000000e+00 : f32
    %27 = vector.broadcast %cst_18 : f32 to vector<8x8x24xf32>
    %28 = arith.select %23, %26, %27 : vector<8x8x24xi1>, vector<8x8x24xf32>
    %cst_19 = arith.constant dense<0.000000e+00> : vector<8x8xf32>
    %29 = vector.multi_reduction <add>, %28, %cst_19 [2] : vector<8x8x24xf32> to vector<8x8xf32>
    %c0_20 = arith.constant 0 : index
    %c0_21 = arith.constant 0 : index
    %30 = vector.load %arg8[%c0_20, %c0_21] : memref<8x32xf32, #tpu.memory_space<vmem>>, vector<8x32xf32>
    %31 = vector.shape_cast %30 : vector<8x32xf32> to vector<8x1x32xf32>
    %32 = vector.broadcast %31 : vector<8x1x32xf32> to vector<8x8x32xf32>
    %33 = arith.mulf %0, %32 : vector<8x8x32xf32>
    %cst_22 = arith.constant dense<0.000000e+00> : vector<8x8xf32>
    %34 = vector.multi_reduction <add>, %33, %cst_22 [2] : vector<8x8x32xf32> to vector<8x8xf32>
    %cst_23 = arith.constant 1.500000e-01 : f32
    %35 = vector.broadcast %cst_23 : f32 to vector<8x8xf32>
    %36 = arith.mulf %35, %34 : vector<8x8xf32>
    %37 = arith.addf %29, %36 : vector<8x8xf32>
    %c0_24 = arith.constant 0 : index
    %c0_25 = arith.constant 0 : index
    %38 = vector.load %arg9[%c0_24, %c0_25] : memref<8x8xf32, #tpu.memory_space<vmem>>, vector<8x8xf32>
    tpu.vector_store %arg9[%c0_24, %c0_25], %37 {strides = array<i32>} : memref<8x8xf32, #tpu.memory_space<vmem>>, vector<8x8xf32>,
    return
  }
  func.func @transform_0(%arg0: i32) -> (i32, i32) {
    %c0_i32 = arith.constant 0 : i32
    %c0_i32_0 = arith.constant 0 : i32
    return %arg0, %c0_i32 : i32, i32
  }
  func.func @transform_1(%arg0: i32) -> (i32, i32) {
    %c0_i32 = arith.constant 0 : i32
    %c0_i32_0 = arith.constant 0 : i32
    return %arg0, %c0_i32 : i32, i32
  }
  func.func @transform_2(%arg0: i32) -> (i32, i32, i32) {
    %c0_i32 = arith.constant 0 : i32
    %c0_i32_0 = arith.constant 0 : i32
    %c0_i32_1 = arith.constant 0 : i32
    return %arg0, %c0_i32, %c0_i32_0 : i32, i32, i32
  }
  func.func @transform_3(%arg0: i32) -> (i32, i32, i32) {
    %c0_i32 = arith.constant 0 : i32
    %c0_i32_0 = arith.constant 0 : i32
    %c0_i32_1 = arith.constant 0 : i32
    return %arg0, %c0_i32, %c0_i32_0 : i32, i32, i32
  }
  func.func @transform_4(%arg0: i32) -> (i32, i32) {
    %c0_i32 = arith.constant 0 : i32
    %c0_i32_0 = arith.constant 0 : i32
    return %arg0, %c0_i32 : i32, i32
  }
  func.func @transform_5(%arg0: i32) -> (i32, i32, i32) {
    %c0_i32 = arith.constant 0 : i32
    %c0_i32_0 = arith.constant 0 : i32
    %c0_i32_1 = arith.constant 0 : i32
    return %arg0, %c0_i32, %c0_i32_0 : i32, i32, i32
  }
  func.func @transform_6(%arg0: i32) -> (i32, i32) {
    %c0_i32 = arith.constant 0 : i32
    %c0_i32_0 = arith.constant 0 : i32
    return %arg0, %c0_i32 : i32, i32
  }
  func.func @transform_7(%arg0: i32) -> (i32, i32) {
    %c0_i32 = arith.constant 0 : i32
    %c0_i32_0 = arith.constant 0 : i32
    return %arg0, %c0_i32 : i32, i32
  }
  func.func @transform_8(%arg0: i32) -> (i32, i32) {
    %c0_i32 = arith.constant 0 : i32
    %c0_i32_0 = arith.constant 0 : i32
    return %arg0, %c0_i32 : i32, i32
  }
}

</mosaic_0001>

<bundles_post_ra>
// kernel: tpu_custom_call.1
= control target key start
LH: loop header
LB: loop body
LE: loop exit
PB: predicated region body
PF: predicated region fallthrough
CT: control target
= control target key end

     0   :  { %s2737_s0 = inlined_call_operand.vmem [shape: s32[32,8], index: 0, kind: input, shape index: {}]   ;;  %s2738_s1 = inlined_call_operand.vmem [shape: s32[32,8], index: 1, kind: input, shape index: {}]   ;;  %s2739_s2 = inlined_call_operand.hbm [shape: f32[32,8,32], index: 2, kind: input, shape index: {}]   ;;  %s2740_s3 = inlined_call_operand.hbm [shape: f32[32,16,32], index: 3, kind: input, shape index: {}]   ;;  %s2741_s4 = inlined_call_operand.vmem [shape: f32[32,16], index: 4, kind: input, shape index: {}]   ;;  %s2742_s5 = inlined_call_operand.hbm [shape: f32[32,8,32], index: 5, kind: input, shape index: {}]   ;;  %s2743_s6 = inlined_call_operand.vmem [shape: f32[32,8], index: 6, kind: input, shape index: {}]   ;;  %s2744_s7 = inlined_call_operand.vmem [shape: f32[32,32], index: 7, kind: input, shape index: {}]   ;;  %s2745_s8 = inlined_call_operand.vmem [shape: f32[32,8], index: 8, kind: output, shape index: {}]  }
   0x1   :  { %2753 = sst [smem:[#allocation11_spill]] %s2739_s2 }
   0x2   :  { %2754 = sst [smem:[#allocation12_spill]] %s2740_s3 }
   0x3   :  { %13 = vsyncpa [#allocation3], 0 }
   0x4   :  { %15 = vsyncpa [#allocation3 + $0x1], 0 }
   0x5   :  { %16 = vsyncpa [#allocation5], 0 }
   0x6   :  { %18 = vsyncpa [#allocation5 + $0x1], 0  ;;  %s2264_s27 = smov 0   ;;  %s2266_s28 = smov 0  }
   0x7   :  { %s2268_s29 = smov 0   ;;  %s2270_s30 = smov 0  }
   0x8 LB: > { %2755 = sst [smem:[#allocation9_spill]] %s2203_s29  ;;  %s2283_s9 = sadd.s32 4294967295, %s2207_s30   ;;  %s2207_s30 = sphi %s2270_s30, %s2776_s30   ;;  %s2203_s29 = sphi %s2268_s29, %s2773_s29   ;;  %s2199_s28 = sphi %s2266_s28, %s2775_s28   ;;  %s2195_s27 = sphi %s2264_s27, %s2774_s27  }
   0x9   : > { %s2286_s10 = sadd.s32 1, %s2207_s30   ;;  %s83_s12 = sadd.s32 1, %s2203_s29 }
   0xa   : > { %s80_s11 = ssub.s32 %s2207_s30, %s2286_s10  ;;  %p90_p1 = scmp.ne.s32.totalorder %s2203_s29, %s2199_s28 }
   0xb   : > { %p81_p0 = scmp.eq.s32.totalorder %s80_s11, 0  ;;  %p91_p2 = scmp.eq.s32.totalorder %s2207_s30, 0 }
   0xc   : > { %p96_p3 = scmp.ne.s32.totalorder %s2199_s28, %s2195_s27  ;;  %p97_p5 = scmp.eq.s32.totalorder %s2283_s9, 0 }
   0xd   : > { %s2296_s13 = scalar_select %p81_p0, %s2203_s29, %s83_s12  }
   0xe   : > { %p92_p4 = por %p91_p2, %p90_p1  ;;  %p2038_p6 = scmp.lt.s32.totalorder %s2207_s30, 4 }
   0xf   : > { %2756 = sst [smem:[#allocation10_spill]] %s2296_s13  ;;  %p2300_p7 = por %p97_p5, %p96_p3 }
  0x10   : > { %s2305_s15 = sand.u32 1, %s2203_s29   ;;  %p2307_p8 = pnand %p2038_p6, %p92_p4 }
  0x11   : > { %s2757_s14 = scalar_select %p2300_p7, 1, 0 }
  0x12   : > { %s311_s17 = sand.u32 1, %s2207_s30   ;;  %s1831_s18 = sshll.u32 %s2305_s15, 7 }
  0x13   : > { %s1884_s19 = sshll.u32 %s2207_s30, 11  ;;  %s2759_s3 = sld [smem:[#allocation12_spill]] }
  0x14   : > { %s315_s23 = scalar_lea.vmem [#allocation4], %s1831_s18  ;;  %s2323_s25 = scalar_lea.sflag [#allocation5], %s311_s17 }
  0x15   : > { %s323_s24 = sshll.u32 %s315_s23, 4  ;;  %p2329_p12 = pneg %p2307_p8  ;;  %s2320_s24 = int_to_ptr.vmem [resolvable:$true] %s323_s24 }
  0x19   : > { %s2317_s22 = scalar_lea.hbm %s2759_s3, %s1884_s19  ;;  %s2084_s18 = scalar_lea.hbm %s2759_s3, 8192 }
  0x1a   : > { %s2079_s26 = scalar_lea.hbm %s2317_s22, 2048  ;;  %p2085_p1 = scmp.lt.u32.totalorder %s2317_s22, %s2759_s3 }
  0x1b   : > { %p2080_p11 = scmp.ne.s32.totalorder %s2317_s22, %s2079_s26  ;;  %p2086_p2 = scmp.lt.u32.totalorder %s2084_s18, %s2079_s26 }
  0x1c   : > { %p2088_p4 = scmp.lt.u32.totalorder %s2079_s26, %s2317_s22 }
  0x1d   : > { %p2082_p13 = pnand %p2329_p12, %p2080_p11  ;;  %p2087_p3 = por %p2086_p2, %p2085_p1 }
  0x1f   : > { %p2083_p0 = pneg %p2082_p13  ;;  %p2089_p5 = por %p2088_p4, %p2087_p3 }
  0x21   : > { %p2090_p6 = pnand %p2089_p5, %p2083_p0 }
  0x23   : > { %2093 = shalt.err (!%p2090_p6)
}
  0x24   : > { %s2094_s17 = scalar_lea.vmem %s2320_s24, 2048  ;;  %s2209_s21 = smov [#allocation4]  }
  0x25   : > { %p2095_p11 = scmp.ne.s32.totalorder %s2320_s24, %s2094_s17  ;;  %s2099_s23 = sshll.u32 %s2209_s21, 4  ;;  %s2100_s23 = int_to_ptr.vmem [resolvable:$false] %s2099_s23 }
  0x26   : > { %s2101_s11 = scalar_lea.vmem %s2100_s23, 4096  ;;  %p2102_p10 = scmp.lt.s32.totalorder %s2320_s24, %s2100_s23 }
  0x27   : > { %p2097_p13 = pnand %p2095_p11, %p2329_p12  ;;  %p2103_p7 = scmp.lt.s32.totalorder %s2101_s11, %s2094_s17 }
  0x29   : > { %p2098_p9 = pneg %p2097_p13  ;;  %p2104_p1 = por %p2103_p7, %p2102_p10 }
  0x2b   : > { %p2105_p2 = pnand %p2104_p1, %p2098_p9 }
  0x2d   : > { %2108 = shalt.err (!%p2105_p2)
}
  0x2e   : > { %s2747_s26 = smov 128   ;;  %s2749_s12 = smov 8  }
  0x2f   : > { %2034 = dma.hbm_to_vmem [thread:$0]  (!%p2307_p8), %s2317_s22, 2048, %s2320_s24, %s2323_s25, %s2747_s26, %s2747_s26, %s2749_s12  }
  0x30   : > { %p2761_p7 = scmp.lt.s32.totalorder %s2207_s30, 5  ;;  %p2762_p9 = scmp.ge.s32.totalorder %s2207_s30, 1 }
  0x31   : > { %s2752_s19 = sshll.u32 %s2305_s15, 6  ;;  %s1882_s20 = sshll.u32 %s2207_s30, 10 }
  0x32   : > { %p2360_p10 = pnand %p2762_p9, %p2761_p7  ;;  %s2764_s2 = sld [smem:[#allocation11_spill]] }
  0x33   : > { %s294_s11 = scalar_lea.vmem [#allocation2], %s2752_s19  ;;  %s2378_s12 = scalar_lea.hbm %s2742_s5, %s1882_s20 }
  0x34   : > { %s2763_s18 = scalar_select %p2360_p10, 1, 0 }
  0x35   : > { %s301_s22 = sshll.u32 %s294_s11, 4  ;;  %s291_s30 = scalar_lea.sflag [#allocation3], %s2305_s15  ;;  %s2373_s22 = int_to_ptr.vmem [resolvable:$true] %s301_s22 }
  0x38   : > { %s2369_s23 = scalar_lea.hbm %s2764_s2, %s1882_s20  ;;  %s2114_s13 = scalar_lea.hbm %s2764_s2, 4096 }
  0x39   : > { %s2109_s3 = scalar_lea.hbm %s2369_s23, 1024  ;;  %p2115_p5 = scmp.lt.u32.totalorder %s2369_s23, %s2764_s2 }
  0x3a   : > { %p2110_p0 = scmp.ne.s32.totalorder %s2369_s23, %s2109_s3  ;;  %p2116_p6 = scmp.lt.u32.totalorder %s2114_s13, %s2109_s3 }
  0x3b   : > { %p2118_p13 = scmp.lt.u32.totalorder %s2109_s3, %s2369_s23 }
  0x3c   : > { %p2112_p3 = pnand %p2110_p0, %p2329_p12  ;;  %p2117_p11 = por %p2116_p6, %p2115_p5 }
  0x3e   : > { %p2113_p4 = pneg %p2112_p3  ;;  %p2119_p1 = por %p2118_p13, %p2117_p11 }
  0x40   : > { %p2120_p2 = pnand %p2119_p1, %p2113_p4 }
  0x42   : > { %2123 = shalt.err (!%p2120_p2)
}
  0x43   : > { %s2124_s26 = scalar_lea.vmem %s2373_s22, 1024  ;;  %s2212_s20 = smov [#allocation2]  }
  0x44   : > { %p2125_p7 = scmp.ne.s32.totalorder %s2373_s22, %s2124_s26  ;;  %s2129_s11 = sshll.u32 %s2212_s20, 4  ;;  %s2130_s11 = int_to_ptr.vmem [resolvable:$false] %s2129_s11 }
  0x45   : > { %s2131_s29 = scalar_lea.vmem %s2130_s11, 2048  ;;  %p2132_p3 = scmp.lt.s32.totalorder %s2373_s22, %s2130_s11 }
  0x46   : > { %p2127_p9 = pnand %p2125_p7, %p2329_p12  ;;  %p2133_p10 = scmp.lt.s32.totalorder %s2131_s29, %s2124_s26 }
  0x48   : > { %p2128_p0 = pneg %p2127_p9  ;;  %p2134_p5 = por %p2133_p10, %p2132_p3 }
  0x4a   : > { %p2135_p6 = pnand %p2134_p5, %p2128_p0 }
  0x4c   : > { %2138 = shalt.err (!%p2135_p6)
}
  0x4d   : > { %s2765_s3 = smov 8   ;;  %s2766_s13 = smov 128  }
  0x4e   : > { %2031 = dma.hbm_to_vmem [thread:$0]  (!%p2307_p8), %s2369_s23, 1024, %s2373_s22, %s291_s30, %s2766_s13, %s2766_s13, %s2765_s3  }
  0x4f   : > { %s2767_s19 = sshll.u32 %s2305_s15, 6  ;;  %s2139_s21 = scalar_lea.hbm %s2378_s12, 1024 }
  0x50   : > { %s344_s24 = scalar_lea.vmem [#allocation6], %s2767_s19  ;;  %p2140_p10 = scmp.ne.s32.totalorder %s2378_s12, %s2139_s21 }
  0x51   : > { %s351_s17 = sshll.u32 %s344_s24, 4  ;;  %s2144_s11 = scalar_lea.hbm %s2742_s5, 4096  ;;  %s2409_s17 = int_to_ptr.vmem [resolvable:$true] %s351_s17 }
  0x52   : > { %p2142_p4 = pnand %p2140_p10, %p2329_p12  ;;  %p2145_p13 = scmp.lt.u32.totalorder %s2378_s12, %s2742_s5 }
  0x53   : > { %p2146_p1 = scmp.lt.u32.totalorder %s2144_s11, %s2139_s21  ;;  %p2148_p7 = scmp.lt.u32.totalorder %s2139_s21, %s2378_s12 }
  0x54   : > { %p2143_p11 = pneg %p2142_p4 }
  0x55   : > { %p2147_p2 = por %p2146_p1, %p2145_p13 }
  0x57   : > { %p2149_p9 = por %p2148_p7, %p2147_p2 }
  0x59   : > { %p2150_p0 = pnand %p2149_p9, %p2143_p11 }
  0x5b   : > { %2153 = shalt.err (!%p2150_p0)
}
  0x5c   : > { %s2154_s15 = scalar_lea.vmem %s2409_s17, 1024  ;;  %s2213_s23 = smov [#allocation6]  }
  0x5d   : > { %p2155_p3 = scmp.ne.s32.totalorder %s2409_s17, %s2154_s15  ;;  %s2159_s22 = sshll.u32 %s2213_s23, 4  ;;  %s2160_s22 = int_to_ptr.vmem [resolvable:$false] %s2159_s22 }
  0x5e   : > { %s2161_s2 = scalar_lea.vmem %s2160_s22, 2048  ;;  %p2162_p10 = scmp.lt.s32.totalorder %s2409_s17, %s2160_s22 }
  0x5f   : > { %p2157_p5 = pnand %p2155_p3, %p2329_p12  ;;  %p2163_p4 = scmp.lt.s32.totalorder %s2161_s2, %s2154_s15 }
  0x61   : > { %p2158_p6 = pneg %p2157_p5  ;;  %p2164_p13 = por %p2163_p4, %p2162_p10 }
  0x63   : > { %p2165_p1 = pnand %p2164_p13, %p2158_p6 }
  0x65   : > { %2168 = shalt.err (!%p2165_p1)
}
  0x66   : > { %2037 = dma.hbm_to_vmem [thread:$0]  (!%p2307_p8), %s2378_s12, 1024, %s2409_s17, %s2323_s25, %s2766_s13, %s2766_s13, %s2765_s3  }
  0x67   : > { %p2768_p12 = scmp.ne.s32.totalorder %s2763_s18, 0 }
  0x68   : > { %s2439_s27 = sand.u32 (!%p2768_p12), 1, %s2199_s28   ;;  %p2769_p11 = scmp.ne.s32.totalorder (!%p2768_p12), %s2757_s14, 0 }
  0x69   : > { %377 = sbr.rel (%p2768_p12) target bundleno = 532 (0x214), region = 52  ;;  %s1839_s30 = sshll.u32 (!%p2768_p12), %s2439_s27, 6 }
  0x6a   : > { %s380_s19 = scalar_lea.sflag (!%p2768_p12), [#allocation3], %s2439_s27  ;;  %s2445_s16 = scalar_lea.vmem (!%p2768_p12), [#allocation2], %s1839_s30 }
  0x70   : > { %2186 = dma.done.wait (%p2769_p11), %s380_s19, 1024  }
  0x71   : > { %2188 = vsyncadd (%p2769_p11), %s380_s19, 4294966272  ;;  %s388_s25 = sand.u32 1, %s2283_s9   ;;  %s1840_s12 = sshll.u32 %s2439_s27, 7 }
  0x72   : > { %s389_s18 = scalar_lea.sflag [#allocation5], %s388_s25  ;;  %s2453_s3 = scalar_lea.vmem [#allocation4], %s1840_s12 }
  0x73   : > { %2190 = dma.done.wait (%p2769_p11), %s389_s18, 3072  }
  0x74   : > { %2192 = vsyncadd (%p2769_p11), %s389_s18, 4294964224  ;;  %v2214_v0 = vmov 0.0|0.0   ;;  %vm2215_vm0 = vmmov 0   ;;  %v2216_v1 = vmov 0.0   ;;  %vm524_vm1 = vcmask 261120   ;;  %p463_p8 = scmp.lt.s32.totalorder %s2283_s9, 3 }
  0x75   : > { %1990 = vmatprep.subr.bf16.mxu0 %v2214_v0  ;;  %1994 = vmatprep.subr.bf16.mxu1 %v2214_v0  ;;  %vm2468_vm2 = vmpackc.low %vm524_vm1, %vm524_vm1  ;;  %v1191_v3 = vlaneseq  ;;  %v500_v4 = vld [vmem:[%s2453_s3] sm:$0xff]  ;;  %v501_v5 = vld [vmem:[%s2453_s3 + $0x8] sm:$0xff]  ;;  %s2495_s21 = scalar_lea.vmem [#allocation6], %s1839_s30  ;;  %s2217_s23 = smov 16   ;;  %vm1189_vm3 = vcmask 130048   ;;  %vm1436_vm10 = vcmask 195584  }
  0x76   : > { %1924 = vmatprep.mubr.msk.f32.mxu0 %vm2215_vm0, %v2216_v1  ;;  %1933 = vmatprep.mubr.msk.f32.mxu1 %vm2215_vm0, %v2216_v1  ;;  %v502_v6 = vld [vmem:[%s2453_s3 + $0x10] sm:$0xff]  ;;  %s2778_s9 = smov (!%p463_p8, %s2283_s9), 3  ;;  %v1991_v7 = vpack.c.bf16 %v501_v5, %v500_v4  ;;  %v503_v8 = vld [vmem:[%s2453_s3 + $0x18] sm:$0xff]  ;;  %v516_v12 = vld [vmem:[%s2495_s21] sm:$0xff] }
  0x77   : > { %v1995_v9 = vpack.c.bf16 %v503_v8, %v502_v6  ;;  %v2480_v10 = vshrl.u32 %v1191_v3, 7  ;;  %s2485_s14 = sshll.u32 %s2778_s9, 3  ;;  %v504_v13 = vld [vmem:[%s2453_s3 + $0x20] sm:$0xff]  ;;  %v505_v14 = vld [vmem:[%s2453_s3 + $0x28] sm:$0xff]  ;;  %v506_v16 = vld [vmem:[%s2453_s3 + $0x30] sm:$0xff] }
  0x78   : > { %1993 = vmatpush3.bf16.xpose.msk.msra.mxu0 %vm2468_vm2, %v1991_v7  ;;  %s466_s17 = scalar_lea.vmem %s2737_s0, %s2485_s14  ;;  %s481_s20 = scalar_lea.vmem %s2743_s6, %s2485_s14  ;;  %v517_v15 = vld [vmem:[%s2495_s21 + $0x8] sm:$0xff]  ;;  %v507_v17 = vld [vmem:[%s2453_s3 + $0x38] sm:$0xff]  ;;  %v2516_v20 = vld [vmem:[%s2445_s16] sm:$0xff]  ;;  %v1999_v21 = vpack.c.bf16 %v505_v14, %v504_v13 }
  0x79   : > { %1997 = vmatpush3.bf16.xpose.msk.msra.mxu1 %vm2468_vm2, %v1995_v9  ;;  %1922 = vmatprep.subr.mxu0 %v2216_v1  ;;  %v1202_v11 = vsub.s32 1, %v2480_v10  ;;  %s470_s15 = scalar_lea.vmem %s2738_s1, %s2485_s14  ;;  %v2511_v18 = vld [vmem:[%s466_s17] sm:$0xff]  ;;  %v1209_v19 = vsub.s32 2, %v2480_v10  ;;  %v2519_v22 = vsub.s32 0, %v2480_v10  ;;  %v2525_v25 = vld [vmem:[%s2445_s16 + $0x8] sm:$0xff]  ;;  %v2003_v26 = vpack.c.bf16 %v507_v17, %v506_v16  ;;  %v518_v35 = vld [vmem:[%s2495_s21 + $0x10] sm:$0xff]  ;;  %s485_s27 = scalar_lea.vmem %s2744_s7, %s2485_s14 }
  0x7a   : > { %1931 = vmatprep.subr.mxu1 %v2216_v1  ;;  %v1183_v24 = vld [vmem:[%s481_s20] sm:$0xff]  ;;  %v1216_v30 = vsub.s32 3, %v2480_v10  ;;  %v509_v37 = vld [vmem:[%s2453_s3 + $0x48] sm:$0xff]  ;;  %v519_v38 = vld [vmem:[%s2495_s21 + $0x18] sm:$0xff]  ;;  %v1223_v44 = vsub.s32 4, %v2480_v10  ;;  %v1230_v49 = vsub.s32 5, %v2480_v10  ;;  %s489_s18 = scalar_lea.vmem %s2745_s8, %s2485_s14 }
  0x7b   : > { %v1203_v23 = vrot.slane %v2511_v18, %v1202_v11  ;;  %v1184_v27 = vmul.f32 0.15, %v1183_v24  ;;  %v499_v28 = vld [vmem:[%s470_s15] sm:$0xff]  ;;  %v1210_v29 = vrot.slane %v2511_v18, %v1209_v19  ;;  %v1196_v31 = vrot.slane %v2511_v18, %v2519_v22  ;;  %v510_v39 = vld [vmem:[%s2453_s3 + $0x50] sm:$0xff]  ;;  %v511_v40 = vld [vmem:[%s2453_s3 + $0x58] sm:$0xff] }
  0x7c   : > { %v2538_v32 = vadd.s32 16, %v499_v28  ;;  %v1217_v33 = vrot.slane %v2511_v18, %v1216_v30  ;;  %v508_v36 = vld [vmem:[%s2453_s3 + $0x40] sm:$0xff]  ;;  %v2560_v42 = vld [vmem:[%s2445_s16 + $0x10] sm:$0xff]  ;;  %v2566_v45 = vld [vmem:[%s2445_s16 + $0x18] sm:$0xff]  ;;  %v2011_v46 = vpack.c.bf16 %v511_v40, %v510_v39  ;;  %v1224_v48 = vrot.slane %v2511_v18, %v1223_v44 }
  0x7d   : > { %1205 = vbcast.lane.b32.xlu1 %v1203_v23, 256  ;;  %1186 = vrot.lane.b32.xlu0 %v1184_v27, %s2217_s23  ;;  %v2007_v43 = vpack.c.bf16 %v509_v37, %v508_v36  ;;  %v1231_v51 = vrot.slane %v2511_v18, %v1230_v49  ;;  %v520_v52 = vld [vmem:[%s2495_s21 + $0x20] sm:$0xff]  ;;  %v513_v54 = vld [vmem:[%s2453_s3 + $0x68] sm:$0xff]  ;;  %v514_v56 = vld [vmem:[%s2453_s3 + $0x70] sm:$0xff]  ;;  %v1237_v61 = vsub.s32 6, %v2480_v10  ;;  %v1244_v6 = vsub.s32 7, %v2480_v10 }
  0x7e   : > { %v1268_v34 = vrot.slane %v2538_v32, %v1202_v11  ;;  %v1261_v41 = vrot.slane %v2538_v32, %v2519_v22  ;;  %v1275_v47 = vrot.slane %v2538_v32, %v1209_v19  ;;  %v1282_v50 = vrot.slane %v2538_v32, %v1216_v30  ;;  %v512_v53 = vld [vmem:[%s2453_s3 + $0x60] sm:$0xff]  ;;  %v521_v55 = vld [vmem:[%s2495_s21 + $0x28] sm:$0xff]  ;;  %v515_v57 = vld [vmem:[%s2453_s3 + $0x78] sm:$0xff] }
  0x7f   : > { %v1289_v58 = vrot.slane %v2538_v32, %v1223_v44  ;;  %v2597_v59 = vld [vmem:[%s2445_s16 + $0x20] sm:$0xff]  ;;  %v2015_v60 = vpack.c.bf16 %v513_v54, %v512_v53  ;;  %v2602_v62 = vld [vmem:[%s2445_s16 + $0x28] sm:$0xff]  ;;  %v2019_v63 = vpack.c.bf16 %v515_v57, %v514_v56  ;;  %v1296_v4 = vrot.slane %v2538_v32, %v1230_v49  ;;  %v522_v2 = vld [vmem:[%s2495_s21 + $0x30] sm:$0xff] }
  0x80   : > { %1923 = vmatpush3.xpose.msk.msra.mxu0 %vm524_vm1, %v516_v12  ;;  %v1238_v5 = vrot.slane %v2511_v18, %v1237_v61  ;;  %v1245_v7 = vrot.slane %v2511_v18, %v1244_v6  ;;  %v523_v8 = vld [vmem:[%s2495_s21 + $0x38] sm:$0xff]  ;;  %v1310_v9 = vrot.slane %v2538_v32, %v1244_v6  ;;  %v496_v11 = vld [vmem:[%s2445_s16 + $0x30] sm:$0xff]  ;;  %v1461_v16 = vld [vmem:[%s485_s27] sm:$0xff] }
  0x81   : > { %1932 = vmatpush3.xpose.msk.msra.mxu1 %vm524_vm1, %v517_v15  ;;  %1998 = vmatprep.subr.bf16.mxu0 %v2214_v0  ;;  %v2632_v12 = vld [vmem:[%s2445_s16 + $0x38] sm:$0xff]  ;;  %v1463_v23 = vcombine.high %v1461_v16, %v1461_v16  ;;  %s476_s16 = scalar_lea.vmem %s2741_s4, %s2485_s14 }
  0x82   : > { %2002 = vmatprep.subr.bf16.mxu1 %v2214_v0  ;;  %1212 = vbcast.lane.b32.xlu1 %v1210_v29, 256  ;;  %v1181_v53 = vld [vmem:[%s476_s16] sm:$0xff] }
  0x83   : > { %1925 = vmatmul.mubr.msk.f32.vlgmr.msra.gmra.mrb[0].mxu0 %vm524_vm1, %v2516_v20  ;;  %1198 = vbcast.lane.b32.xlu0 %v1196_v31, 256  ;;  %v1182_v54 = vmul.f32 0.7, %v1181_v53 }
  0x84   : > { %1934 = vmatmul.mubr.msk.f32.vlgmr.msra.gmra.mrb[0].mxu1 %vm524_vm1, %v2525_v25  ;;  %2001 = vmatpush3.bf16.xpose.msk.msra.mxu0 %vm2468_vm2, %v1999_v21 }
  0x85   : > { %2005 = vmatpush3.bf16.xpose.msk.msra.mxu1 %vm2468_vm2, %v2003_v26  ;;  %1940 = vmatprep.subr.mxu0 %v2216_v1 }
  0x86   : > { %1949 = vmatprep.subr.mxu1 %v2216_v1  ;;  %1942 = vmatprep.mubr.msk.f32.mxu0 %vm2215_vm0, %v2216_v1 }
  0x87   : > { %1951 = vmatprep.mubr.msk.f32.mxu1 %vm2215_vm0, %v2216_v1  ;;  %1219 = vbcast.lane.b32.xlu1 %v1217_v33, 256 }
  0x88   : > { %1270 = vbcast.lane.b32.xlu0 %v1268_v34, 256 }
  0x8b   : > { %1263 = vbcast.lane.b32.xlu1 %v1261_v41, 256 }
  0x8c   : > { %1941 = vmatpush3.xpose.msk.msra.mxu0 %vm524_vm1, %v518_v35  ;;  %1277 = vbcast.lane.b32.xlu0 %v1275_v47, 256 }
  0x8d   : > { %1950 = vmatpush3.xpose.msk.msra.mxu1 %vm524_vm1, %v519_v38  ;;  %2006 = vmatprep.subr.bf16.mxu0 %v2214_v0 }
  0x8e   : > { %2010 = vmatprep.subr.bf16.mxu1 %v2214_v0 }
  0x8f   : > { %1943 = vmatmul.mubr.msk.f32.vlgmr.msra.gmra.mrb[2].mxu0 %vm524_vm1, %v2560_v42  ;;  %1226 = vbcast.lane.b32.xlu1 %v1224_v48, 256 }
  0x90   : > { %1952 = vmatmul.mubr.msk.f32.vlgmr.msra.gmra.mrb[2].mxu1 %vm524_vm1, %v2566_v45  ;;  %2009 = vmatpush3.bf16.xpose.msk.msra.mxu0 %vm2468_vm2, %v2007_v43 }
  0x91   : > { %2013 = vmatpush3.bf16.xpose.msk.msra.mxu1 %vm2468_vm2, %v2011_v46  ;;  %1958 = vmatprep.subr.mxu0 %v2216_v1 }
  0x92   : > { %1967 = vmatprep.subr.mxu1 %v2216_v1  ;;  %1960 = vmatprep.mubr.msk.f32.mxu0 %vm2215_vm0, %v2216_v1 }
  0x93   : > { %1969 = vmatprep.mubr.msk.f32.mxu1 %vm2215_vm0, %v2216_v1  ;;  %1284 = vbcast.lane.b32.xlu0 %v1282_v50, 256 }
  0x94   : > { %1233 = vbcast.lane.b32.xlu1 %v1231_v51, 256 }
  0x97   : > { %1291 = vbcast.lane.b32.xlu0 %v1289_v58, 256 }
  0x98   : > { %1959 = vmatpush3.xpose.msk.msra.mxu0 %vm524_vm1, %v520_v52  ;;  %1240 = vbcast.lane.b32.xlu1 %v1238_v5, 256 }
  0x99   : > { %1968 = vmatpush3.xpose.msk.msra.mxu1 %vm524_vm1, %v521_v55  ;;  %2014 = vmatprep.subr.bf16.mxu0 %v2214_v0 }
  0x9a   : > { %2018 = vmatprep.subr.bf16.mxu1 %v2214_v0  ;;  %v1303_v0 = vrot.slane %v2538_v32, %v1237_v61  ;;  %v2676_v61 = vand.u32 127, %v1191_v3 }
  0x9b   : > { %1961 = vmatmul.mubr.msk.f32.vlgmr.msra.gmra.mrb[4].mxu0 %vm524_vm1, %v2597_v59  ;;  %1298 = vbcast.lane.b32.xlu0 %v1296_v4, 256 }
  0x9c   : > { %1970 = vmatmul.mubr.msk.f32.vlgmr.msra.gmra.mrb[4].mxu1 %vm524_vm1, %v2602_v62  ;;  %2017 = vmatpush3.bf16.xpose.msk.msra.mxu0 %vm2468_vm2, %v2015_v60 }
  0x9d   : > { %2021 = vmatpush3.bf16.xpose.msk.msra.mxu1 %vm2468_vm2, %v2019_v63  ;;  %1976 = vmatprep.subr.mxu0 %v2216_v1 }
  0x9e   : > { %1985 = vmatprep.subr.mxu1 %v2216_v1  ;;  %1978 = vmatprep.mubr.msk.f32.mxu0 %vm2215_vm0, %v2216_v1 }
  0x9f   : > { %1987 = vmatprep.mubr.msk.f32.mxu1 %vm2215_vm0, %v2216_v1  ;;  %1305 = vbcast.lane.b32.xlu0 %v1303_v0, 256  ;;  %v2218_v1 = vmov 1966171168  }
  0xa0   : > { %1247 = vbcast.lane.b32.xlu1 %v1245_v7, 256  ;;  %v1333_v13 = vunpack.c.l.s4 %v2218_v1 }
  0xa2   : > { %v1334_v14 = vunpack.c.0.s8 %v1333_v13 }
  0xa3   : > { %1312 = vbcast.lane.b32.xlu0 %v1310_v9, 256 }
  0xa4   : > { %1977 = vmatpush3.xpose.msk.msra.mxu0 %vm524_vm1, %v522_v2  ;;  %v2642_v15 = vsub.s32 %v1334_v14, %v2480_v10 }
  0xa5   : > { %1986 = vmatpush3.xpose.msk.msra.mxu1 %vm524_vm1, %v523_v8 }
  0xa6   : > { %v1470_v17 = vrot.slane %v1461_v16, %v2642_v15  ;;  %v1477_v28 = vrot.slane %v1463_v23, %v2642_v15 }
  0xa7   : > { %1979 = vmatmul.mubr.msk.f32.vlgmr.msra.gmra.mrb[6].mxu0 %vm524_vm1, %v496_v11 }
  0xa8   : > { %1988 = vmatmul.mubr.msk.f32.vlgmr.msra.gmra.mrb[6].mxu1 %vm524_vm1, %v2632_v12  ;;  %v1478_v18 = vcombine.high %v1470_v17, %v1470_v17  ;;  %v1486_v19 = vrot.slane %v1470_v17, %v2642_v15  ;;  %v1493_v32 = vrot.slane %v1477_v28, %v2642_v15  ;;  %v1479_v33 = vcombine.high %v1477_v28, %v1477_v28 }
  0xaa   : > { %v1500_v21 = vrot.slane %v1478_v18, %v2642_v15  ;;  %v1515_v26 = vrot.slane %v1486_v19, %v2519_v22  ;;  %v1531_v37 = vrot.slane %v1493_v32, %v2519_v22  ;;  %v1507_v38 = vrot.slane %v1479_v33, %v2642_v15 }
  0xab   : > { %v1508_v44 = vcombine.high %v1486_v19, %v1486_v19 }
  0xac   : > { %v1519_v24 = vrot.slane %v1500_v21, %v2519_v22  ;;  %v1510_v27 = vcombine.high %v1500_v21, %v1500_v21  ;;  %v1552_v30 = vmul.f32 %v1515_v26, %v2516_v20  ;;  %v1556_v20 = vmul.f32 %v1531_v37, %v2597_v59 }
  0xad   : > { %v1535_v39 = vrot.slane %v1507_v38, %v2519_v22  ;;  %v1523_v46 = vrot.slane %v1508_v44, %v2519_v22  ;;  %v1511_v5 = vcombine.high %v1507_v38, %v1507_v38 }
  0xae   : > { %v1553_v29 = vmul.f32 %v1519_v24, %v2525_v25  ;;  %v1527_v31 = vrot.slane %v1510_v27, %v2519_v22  ;;  %v1560_v35 = vsel %vm524_vm1, %v1552_v30, 0.0  ;;  %v1572_v40 = vsel %vm524_vm1, %v1556_v20, 0.0 }
  0xaf   : > { %v1557_v41 = vmul.f32 %v1535_v39, %v2602_v62  ;;  %v1554_v48 = vmul.f32 %v1523_v46, %v2560_v42  ;;  %v1543_v7 = vrot.slane %v1511_v5, %v2519_v22 }
  0xb0   : > { %v1563_v34 = vsel %vm524_vm1, %v1553_v29, 0.0  ;;  %v1555_v36 = vmul.f32 %v1527_v31, %v2566_v45  ;;  %v1509_v45 = vcombine.high %v1493_v32, %v1493_v32 }
  0xb1   : > { %v1575_v43 = vsel %vm524_vm1, %v1557_v41, 0.0  ;;  %v1566_v50 = vsel %vm524_vm1, %v1554_v48, 0.0  ;;  %v1559_v16 = vmul.f32 %v1543_v7, %v2632_v12 }
  0xb2   : > { %v1569_v25 = vsel %vm524_vm1, %v1555_v36, 0.0  ;;  %v1539_v47 = vrot.slane %v1509_v45, %v2519_v22 }
  0xb3   : > { %v1581_v26 = vsel %vm524_vm1, %v1559_v16, 0.0 }
  0xb4   : > { %v1558_v49 = vmul.f32 %v1539_v47, %v496_v11 }
  0xb6   : > { %v1578_v51 = vsel %vm524_vm1, %v1558_v49, 0.0 }
  0xc2   : > { %1564 = vadd.xlane.f32.xlu0 %v1563_v34 }
  0xc4   : > { %1561 = vadd.xlane.f32.xlu1 %v1560_v35 }
  0xc6   : > { %1567 = vadd.xlane.f32.xlu0 %v1566_v50 }
  0xc8   : > { %1570 = vadd.xlane.f32.xlu1 %v1569_v25 }
  0xcc   : > { %1573 = vadd.xlane.f32.xlu1 %v1572_v40 }
  0xd0   : > { %1576 = vadd.xlane.f32.xlu1 %v1575_v43 }
  0xd4   : > { %1579 = vadd.xlane.f32.xlu1 %v1578_v51 }
  0xef   : > { %v1206_v52 = vpop.permute.xlu1 %1205  ;;  %v1187_v55 = vpop.permute.xlu0 %1186 }
  0xf0   : > { %v1190_v57 = vsel %vm1189_vm3, %v1182_v54, %v1187_v55  ;;  %vm1250_vm6 = vcmp.eq.s32.totalorder %v2676_v61, %v1206_v52 }
  0xf1   : > { %v1338_v42 = vrot.slane %v1190_v57, %v2642_v15  ;;  %v1331_v28 = vcombine.high %v1190_v57, %v1190_v57 }
  0xf3   : > { %v1346_v60 = vcombine.high %v1338_v42, %v1338_v42  ;;  %v1354_v62 = vrot.slane %v1338_v42, %v2642_v15  ;;  %v1345_v31 = vrot.slane %v1331_v28, %v2642_v15 }
  0xf4   : > { %v1213_v56 = vpop.permute.xlu1 %1212 }
  0xf5   : > { %v1199_v59 = vpop.permute.xlu0 %1198  ;;  %v1368_v4 = vrot.slane %v1346_v60, %v2642_v15  ;;  %v1383_v0 = vrot.slane %v1354_v62, %v2519_v22  ;;  %v1376_v23 = vcombine.high %v1354_v62, %v1354_v62  ;;  %vm1251_vm11 = vcmp.eq.s32.totalorder %v2676_v61, %v1213_v56 }
  0xf6   : > { %vm1249_vm4 = vcmp.eq.s32.totalorder %v2676_v61, %v1199_v59  ;;  %v1347_v40 = vcombine.high %v1345_v31, %v1345_v31  ;;  %v1361_v44 = vrot.slane %v1345_v31, %v2642_v15 }
  0xf7   : > { %v1387_v3 = vrot.slane %v1368_v4, %v2519_v22  ;;  %v1378_v24 = vcombine.high %v1368_v4, %v1368_v4  ;;  %v1391_v12 = vrot.slane %v1376_v23, %v2519_v22 }
  0xf8   : > { %v1375_v46 = vrot.slane %v1347_v40, %v2642_v15  ;;  %v1399_v47 = vrot.slane %v1361_v44, %v2519_v22  ;;  %v1377_v60 = vcombine.high %v1361_v44, %v1361_v44 }
  0xf9   : > { %v1220_v58 = vpop.permute.xlu1 %1219  ;;  %v1395_v29 = vrot.slane %v1378_v24, %v2519_v22 }
  0xfa   : > { %v1271_v6 = vpop.permute.xlu0 %1270  ;;  %vm1252_vm13 = vcmp.eq.s32.totalorder %v2676_v61, %v1220_v58  ;;  %v1403_v50 = vrot.slane %v1375_v46, %v2519_v22  ;;  %v1407_v4 = vrot.slane %v1377_v60, %v2519_v22 }
  0xfb   : > { %vm1315_vm7 = vcmp.eq.s32.totalorder %v2676_v61, %v1271_v6 }
  0xfc   : > { %vm1323_vm9 = vmor %vm1250_vm6, %vm1315_vm7 }
  0xfd   : > { %v1264_v63 = vpop.permute.xlu1 %1263 }
  0xfe   : > { %vm1314_vm5 = vcmp.eq.s32.totalorder %v2676_v61, %v1264_v63  ;;  %v1278_v8 = vpop.permute.xlu0 %1277  ;;  %v1379_v63 = vcombine.high %v1375_v46, %v1375_v46 }
  0xff   : > { %vm1322_vm8 = vmor %vm1249_vm4, %vm1314_vm5  ;;  %vm1316_vm12 = vcmp.eq.s32.totalorder %v2676_v61, %v1278_v8 }
 0x100   : > { %vm1324_vm15 = vmor %vm1251_vm11, %vm1316_vm12  ;;  %v1411_v6 = vrot.slane %v1379_v63, %v2519_v22 }
 0x101   : > { %v1227_v30 = vpop.permute.xlu1 %1226 }
 0x102   : > { %vm1253_vm1 = vcmp.eq.s32.totalorder %v2676_v61, %v1227_v30 }
 0x105   : > { %v1285_v27 = vpop.permute.xlu0 %1284 }
 0x106   : > { %vm1317_vm14 = vcmp.eq.s32.totalorder %v2676_v61, %v1285_v27  ;;  %v1234_v41 = vpop.permute.xlu1 %1233 }
 0x107   : > { %vm1325_vm0 = vmor %vm1252_vm13, %vm1317_vm14  ;;  %vm1254_vm3 = vcmp.eq.s32.totalorder %v2676_v61, %v1234_v41  ;;  %vm1642_vm14 = vcmask 1042434  }
 0x109   : > { %v1292_v33 = vpop.permute.xlu0 %1291 }
 0x10a   : > { %vm1318_vm2 = vcmp.eq.s32.totalorder %v2676_v61, %v1292_v33  ;;  %v1241_v48 = vpop.permute.xlu1 %1240 }
 0x10b   : > { %vm1326_vm5 = vmor %vm1253_vm1, %vm1318_vm2  ;;  %vm1648_vm1 = vcmask 1045509   ;;  %vm1650_vm2 = vcmask 1046534  }
 0x10d   : > { %v1299_v43 = vpop.permute.xlu0 %1298 }
 0x10e   : > { %vm1319_vm4 = vcmp.eq.s32.totalorder %v2676_v61, %v1299_v43 }
 0x10f   : > { %vm1327_vm6 = vmor %vm1254_vm3, %vm1319_vm4  ;;  %vm1652_vm3 = vcmask 1047559   ;;  %vm1655_vm4 = vcmask 64512  }
 0x111   : > { %v1306_v51 = vpop.permute.xlu0 %1305 }
 0x112   : > { %v1248_v58 = vpop.permute.xlu1 %1247  ;;  %vm1320_vm11 = vcmp.eq.s32.totalorder %v2676_v61, %v1306_v51 }
 0x113   : > { %vm1256_vm7 = vcmp.eq.s32.totalorder %v2676_v61, %v1248_v58 }
 0x115   : > { %v1313_v59 = vpop.permute.xlu0 %1312 }
 0x14f   : > { %v1565_v16 = vpop.xlane.xlu0 %1564 }
 0x150   : > { %v1585_v28 = vmul.f32 0.15, %v1565_v16 }
 0x156   : > { %v603_v2 = vpop.f32.mrb[0].mxu0 }
 0x157   : > { %v1420_v9 = vmul.f32 %v1383_v0, %v603_v2  ;;  %v1926_v11 = vpop.f32.mrb[1].mxu0  ;;  %v685_v1 = vpop.f32.mrb[0].mxu1 }
 0x158   : > { %v1421_v13 = vmul.f32 %v1387_v3, %v685_v1  ;;  %v1935_v14 = vpop.f32.mrb[1].mxu1 }
 0x159   : > { %v1428_v17 = vsel %vm1322_vm8, %v1420_v9, 0.0  ;;  %vm1321_vm8 = vcmp.eq.s32.totalorder %v2676_v61, %v1313_v59  ;;  %v1562_v14 = vpop.xlane.xlu1 %1561 }
 0x15a   : > { %v1429_v18 = vsel %vm1323_vm9, %v1421_v13, 0.0  ;;  %v1437_v19 = vsel %vm1436_vm10, %v1428_v17, 0.0  ;;  %vm1255_vm9 = vcmp.eq.s32.totalorder %v2676_v61, %v1241_v48  ;;  %vm1329_vm12 = vmor %vm1256_vm7, %vm1321_vm8  ;;  %v1584_v27 = vmul.f32 0.15, %v1562_v14 }
 0x15b   : > { %v1440_v21 = vsel %vm1436_vm10, %v1429_v18, 0.0  ;;  %1438 = vadd.xlane.f32.xlu1 %v1437_v19  ;;  %vm1328_vm13 = vmor %vm1255_vm9, %vm1320_vm11  ;;  %v1568_v18 = vpop.xlane.xlu0 %1567 }
 0x15c   : > { %1441 = vadd.xlane.f32.xlu0 %v1440_v21 }
 0x15d   : > { %v1571_v17 = vpop.xlane.xlu1 %1570 }
 0x15e   : > { %v1587_v31 = vmul.f32 0.15, %v1571_v17 }
 0x15f   : > { %1582 = vadd.xlane.f32.xlu1 %v1581_v26 }
 0x161   : > { %v1574_v22 = vpop.xlane.xlu1 %1573 }
 0x162   : > { %v767_v32 = vpop.f32.mrb[2].mxu0 }
 0x163   : > { %v1422_v34 = vmul.f32 %v1391_v12, %v767_v32  ;;  %v1944_v35 = vpop.f32.mrb[3].mxu0  ;;  %v849_v36 = vpop.f32.mrb[2].mxu1  ;;  %v1610_v32 = vsub.s32 %v2676_v61, %v2480_v10 }
 0x164   : > { %v1423_v37 = vmul.f32 %v1395_v29, %v849_v36  ;;  %v1953_v38 = vpop.f32.mrb[3].mxu1  ;;  %v1586_v29 = vmul.f32 0.15, %v1568_v18  ;;  %v1588_v35 = vmul.f32 0.15, %v1574_v22 }
 0x165   : > { %v1430_v25 = vsel %vm1324_vm15, %v1422_v34, 0.0  ;;  %v1577_v21 = vpop.xlane.xlu1 %1576  ;;  %vm1644_vm15 = vcmask 1043459  }
 0x166   : > { %v1443_v20 = vsel %vm1436_vm10, %v1430_v25, 0.0  ;;  %v1431_v39 = vsel %vm1325_vm0, %v1423_v37, 0.0  ;;  %v1589_v38 = vmul.f32 0.15, %v1577_v21  ;;  %vm1646_vm0 = vcmask 1044484  }
 0x167   : > { %1444 = vadd.xlane.f32.xlu0 %v1443_v20  ;;  %v1446_v45 = vsel %vm1436_vm10, %v1431_v39, 0.0 }
 0x169   : > { %v1580_v24 = vpop.xlane.xlu1 %1579 }
 0x16b   : > { %1447 = vadd.xlane.f32.xlu0 %v1446_v45 }
 0x16e   : > { %v931_v49 = vpop.f32.mrb[4].mxu0 }
 0x16f   : > { %v1424_v52 = vmul.f32 %v1399_v47, %v931_v49  ;;  %v1013_v15 = vpop.f32.mrb[4].mxu1  ;;  %v1962_v53 = vpop.f32.mrb[5].mxu0  ;;  %v1590_v47 = vmul.f32 0.15, %v1580_v24 }
 0x170   : > { %v1425_v54 = vmul.f32 %v1403_v50, %v1013_v15  ;;  %v1971_v55 = vpop.f32.mrb[5].mxu1 }
 0x171   : > { %v1432_v56 = vsel %vm1326_vm5, %v1424_v52, 0.0 }
 0x172   : > { %v1449_v57 = vsel %vm1436_vm10, %v1432_v56, 0.0  ;;  %v1433_v42 = vsel %vm1327_vm6, %v1425_v54, 0.0 }
 0x173   : > { %1450 = vadd.xlane.f32.xlu0 %v1449_v57  ;;  %v1452_v62 = vsel %vm1436_vm10, %v1433_v42, 0.0 }
 0x177   : > { %1453 = vadd.xlane.f32.xlu0 %v1452_v62 }
 0x17a   : > { %v1095_v5 = vpop.f32.mrb[6].mxu0 }
 0x17b   : > { %v1426_v0 = vmul.f32 %v1407_v4, %v1095_v5  ;;  %v1177_v3 = vpop.f32.mrb[6].mxu1  ;;  %v1980_v7 = vpop.f32.mrb[7].mxu0 }
 0x17c   : > { %v1427_v2 = vmul.f32 %v1411_v6, %v1177_v3  ;;  %v1989_v8 = vpop.f32.mrb[7].mxu1 }
 0x17d   : > { %v1434_v9 = vsel %vm1328_vm13, %v1426_v0, 0.0 }
 0x17e   : > { %v1435_v11 = vsel %vm1329_vm12, %v1427_v2, 0.0  ;;  %v1455_v1 = vsel %vm1436_vm10, %v1434_v9, 0.0 }
 0x17f   : > { %v1458_v13 = vsel %vm1436_vm10, %v1435_v11, 0.0  ;;  %1456 = vadd.xlane.f32.xlu0 %v1455_v1  ;;  %vm1640_vm10 = vcmask 1041409  }
 0x180   : > { %1459 = vadd.xlane.f32.xlu1 %v1458_v13 }
 0x1e8   : > { %v1439_v30 = vpop.xlane.xlu1 %1438 }
 0x1e9   : > { %v1442_v19 = vpop.xlane.xlu0 %1441  ;;  %v1592_v34 = vadd.f32 %v1584_v27, %v1439_v30 }
 0x1ea   : > { %v1593_v33 = vadd.f32 %v1585_v28, %v1442_v19 }
 0x1eb   : > { %v1611_v41 = vrot.slane %v1592_v34, %v1610_v32 }
 0x1ec   : > { %v1583_v39 = vpop.xlane.xlu1 %1582  ;;  %v1615_v40 = vrot.slane %v1593_v33, %v1610_v32 }
 0x1ed   : > { %v1591_v46 = vmul.f32 0.15, %v1583_v39 }
 0x1ee   : > { %v1641_v61 = vsel %vm1640_vm10, %v1615_v40, %v1611_v41 }
 0x1f4   : > { %v1445_v23 = vpop.xlane.xlu0 %1444 }
 0x1f5   : > { %v1594_v36 = vadd.f32 %v1586_v29, %v1445_v23 }
 0x1f7   : > { %v1619_v44 = vrot.slane %v1594_v36, %v1610_v32 }
 0x1f8   : > { %v1448_v26 = vpop.xlane.xlu0 %1447 }
 0x1f9   : > { %v1595_v25 = vadd.f32 %v1587_v31, %v1448_v26  ;;  %v1643_v50 = vsel %vm1642_vm14, %v1619_v44, %v1641_v61 }
 0x1fb   : > { %v1623_v45 = vrot.slane %v1595_v25, %v1610_v32 }
 0x1fd   : > { %v1645_v15 = vsel %vm1644_vm15, %v1623_v45, %v1643_v50 }
 0x200   : > { %v1451_v12 = vpop.xlane.xlu0 %1450 }
 0x201   : > { %v1596_v20 = vadd.f32 %v1588_v35, %v1451_v12 }
 0x203   : > { %v1627_v10 = vrot.slane %v1596_v20, %v1610_v32 }
 0x204   : > { %v1454_v37 = vpop.xlane.xlu0 %1453 }
 0x205   : > { %v1597_v43 = vadd.f32 %v1589_v38, %v1454_v37  ;;  %v1647_v54 = vsel %vm1646_vm0, %v1627_v10, %v1645_v15 }
 0x207   : > { %v1631_v48 = vrot.slane %v1597_v43, %v1610_v32 }
 0x209   : > { %v1649_v56 = vsel %vm1648_vm1, %v1631_v48, %v1647_v54 }
 0x20c   : > { %v1457_v49 = vpop.xlane.xlu0 %1456 }
 0x20d   : > { %v1460_v51 = vpop.xlane.xlu1 %1459  ;;  %v1598_v52 = vadd.f32 %v1590_v47, %v1457_v49 }
 0x20e   : > { %v1599_v53 = vadd.f32 %v1591_v46, %v1460_v51 }
 0x20f   : > { %v1635_v55 = vrot.slane %v1598_v52, %v1610_v32 }
 0x210   : > { %v1639_v57 = vrot.slane %v1599_v53, %v1610_v32 }
 0x211   : > { %v1651_v42 = vsel %vm1650_vm2, %v1635_v55, %v1649_v56 }
 0x212   : > { %v1653_v58 = vsel %vm1652_vm3, %v1639_v57, %v1651_v42 }
 0x213   : > { %1656 = vst.msk [vmem:[%s489_s18] sm:$0xff] %vm1655_vm4, %v1653_v58 }
 0x214 PF: > { %s2772_s3 = sld [smem:[#allocation9_spill]]  ;;  %s2773_s29 = sld [smem:[#allocation10_spill]] }
 0x215   : > { %p21_p2 = scmp.ge.s32.totalorder %s2286_s10, 6   ;;  %s2774_s27 = smov %s2199_s28 }
 0x216   : > { %s2776_s30 = smov %s2286_s10 }
 0x217   :  { %23 = sbr.rel (!%p21_p2) target bundleno = 8 (0x8), region = 131 }
 0x21a   : > { %s2775_s28 = smov %s2772_s3 }
 0x21e   :  { %1676 = vsyncpa [#allocation3], 1 }
 0x21f   :  { %1678 = vsyncpa [#allocation3 + $0x1], 1 }
 0x220   :  { %1679 = vsyncpa [#allocation5], 1 }
 0x221   :  { %1681 = vsyncpa [#allocation5 + $0x1], 1 }

</bundles_post_ra>
